<compile_context>
chip_gen: v6e
topology: v6e:2x2x1
jax: 0.10.0
libtpu: 0.0.40
codegen_flags: <defaults>
</compile_context>

<pallas_src>
import functools

import jax
import jax.numpy as jnp
from jax.experimental import pallas as pl
from jax.experimental.pallas import tpu as pltpu


def _coord_attention_kernel(x_ref, sel_ref, ahT_ref, awT_ref, psc_ref,
                            w1_ref, b1_ref, w2_ref, b2_ref, w3_ref, b3_ref,
                            o_ref, pooled_ref, *, hdim, wdim, chunk):
    hw = hdim * wdim
    n_chunks = hw // chunk

    # ---- Phase 1: coordinate pooling on the MXU, chunked over the HW axis ----
    # sel[p, :H] is the 0/1 row-selector (h'==h(p)); sel[p, H:] the col-selector.
    pooled_ref[...] = jnp.zeros_like(pooled_ref)

    @pl.loop(0, n_chunks)
    def _pool(ci):
        start = pl.multiple_of(ci * chunk, chunk)
        xb = x_ref[0, :, pl.ds(start, chunk)].astype(jnp.bfloat16)     # (C, chunk)
        sb = sel_ref[pl.ds(start, chunk), :]                           # (chunk, H+W) bf16
        pooled_ref[...] += jnp.dot(xb, sb, preferred_element_type=jnp.float32)

    # row/col sums -> means (1/W on the H columns, 1/H on the W columns), f32.
    pooled = pooled_ref[...] * psc_ref[...]                            # (C, H+W)

    # ---- conv1 (1x1, eval-mode BN pre-folded) + h_swish on the fused strip ----
    y = jnp.dot(w1_ref[...], pooled, preferred_element_type=jnp.float32) + b1_ref[...]
    y = y * jnp.clip(y + 3.0, 0.0, 6.0) * (1.0 / 6.0)                  # h_swish, (tc, H+W)

    y_h = y[:, :hdim]                                                  # (tc, H)
    y_w = y[:, hdim:]                                                  # (tc, W)

    # ---- conv2 / conv3 (1x1) + sigmoid -> per-coordinate gates ----
    out_h = jax.nn.sigmoid(
        jnp.dot(w2_ref[...], y_h, preferred_element_type=jnp.float32) + b2_ref[...])
    out_w = jax.nn.sigmoid(
        jnp.dot(w3_ref[...], y_w, preferred_element_type=jnp.float32) + b3_ref[...])
    out_h = out_h.astype(jnp.bfloat16)    # gates in [0,1]; only bf16 rounding
    out_w = out_w.astype(jnp.bfloat16)

    # ---- Phase 2: broadcast gates over HW (0/1 matmuls, MXU) and apply ----
    # Chunked so only (C, chunk) f32 temporaries are ever live.
    @pl.loop(0, n_chunks)
    def _gate(ci):
        start = pl.multiple_of(ci * chunk, chunk)
        gh = jnp.dot(out_h, ahT_ref[:, pl.ds(start, chunk)],
                     preferred_element_type=jnp.float32)               # (C, chunk)
        gw = jnp.dot(out_w, awT_ref[:, pl.ds(start, chunk)],
                     preferred_element_type=jnp.float32)               # (C, chunk)
        xb = x_ref[0, :, pl.ds(start, chunk)]
        o_ref[0, :, pl.ds(start, chunk)] = (xb * gh * gw).astype(o_ref.dtype)


def _pick_gating_chunk(hw, c):
    """Largest HW-dividing chunk whose live (C, chunk) temporaries stay ~<6 MiB."""
    budget = 6 << 20                       # bytes of live per-chunk temporaries
    per_lane = 14 * max(int(c), 1)         # bf16 x copy + 2 f32 gates + f32 product
    max_chunk = min(4096, max(256, (budget // per_lane) // 128 * 128))
    if hw <= max_chunk:
        return hw
    best = best_aligned = None
    for cand in range(128, max_chunk + 1):
        if hw % cand == 0:
            best = cand
            if cand % 128 == 0:
                best_aligned = cand        # prefer lane-tile-aligned chunks
    return best_aligned or best or hw


def coord_attention(x, params, *, eps=1e-5, gating_chunk=None):
    """x: (N, C, H, W) float32. params: dict of weights (see init_params). Eval mode."""
    N, C, H, W = x.shape
    HW = H * W
    Co = params["w2"].shape[0]
    assert Co == C, "gating (identity * out_h * out_w) requires out_channels == in_channels"

    # Fold eval-mode BatchNorm into conv1 (host side, once).
    scale = params["gamma"] / jnp.sqrt(params["var"] + eps)             # (tc, 1)
    w1f = params["w1"] * scale                                          # (tc, C)
    b1f = (params["b1"] - params["mean"]) * scale + params["beta"]      # (tc, 1)

    # Constant 0/1 selection matrices (exact in bf16) for MXU pooling / broadcast.
    lin = jnp.arange(HW, dtype=jnp.int32)
    h_of = lin // W
    w_of = lin % W
    ah = h_of[:, None] == jnp.arange(H, dtype=jnp.int32)[None, :]       # (HW, H) bool
    aw = w_of[:, None] == jnp.arange(W, dtype=jnp.int32)[None, :]       # (HW, W) bool
    sel = jnp.concatenate([ah, aw], axis=1).astype(jnp.bfloat16)        # (HW, H+W)
    ahT = ah.T.astype(jnp.bfloat16)                                     # (H, HW)
    awT = aw.T.astype(jnp.bfloat16)                                     # (W, HW)
    # Sum -> mean scaling kept as an exact f32 row (not folded into bf16 columns).
    pscale = jnp.concatenate([jnp.full((H,), 1.0 / W, jnp.float32),
                              jnp.full((W,), 1.0 / H, jnp.float32)])[None, :]   # (1, H+W)

    chunk = int(gating_chunk) if gating_chunk is not None else _pick_gating_chunk(HW, C)
    assert HW % chunk == 0, f"gating chunk {chunk} must divide H*W={HW}"

    x2 = x.reshape(N, C, HW)   # free: NCHW is contiguous over (H, W)

    consts = [sel, ahT, awT, pscale, w1f, b1f,
              params["w2"], params["b2"], params["w3"], params["b3"]]

    kernel = functools.partial(_coord_attention_kernel, hdim=H, wdim=W, chunk=chunk)

    slab = C * HW * 4
    const_bytes = sum(int(p.size) * p.dtype.itemsize for p in consts)
    # live per-chunk temporaries + pooled accumulator scratch + headroom
    chunk_bytes = 14 * C * chunk + 4 * C * (H + W) + (2 << 20)
    try:
        vmem_cap = int(pltpu.get_tpu_info().vmem_capacity_bytes)
    except Exception:
        vmem_cap = 64 << 20   # smallest per-core VMEM across supported generations (v7x)

    def run(single_buffer_consts):
        def const_spec(p):
            nd = p.ndim
            idx = lambda n, _nd=nd: (0,) * _nd
            if single_buffer_consts:
                # Constant index_map -> never re-fetched; one VMEM copy suffices.
                return pl.BlockSpec(p.shape, idx, pipeline_mode=pl.Buffered(1))
            return pl.BlockSpec(p.shape, idx)

        in_specs = [pl.BlockSpec((1, C, HW), lambda n: (n, 0, 0))] + \
                   [const_spec(p) for p in consts]
        out_specs = pl.BlockSpec((1, C, HW), lambda n: (n, 0, 0))

        need = 4 * slab + (1 if single_buffer_consts else 2) * const_bytes + chunk_bytes
        vmem_limit = int(min(max(need, 32 << 20), int(0.85 * vmem_cap)))

        return pl.pallas_call(
            kernel,
            out_shape=jax.ShapeDtypeStruct((N, C, HW), x.dtype),
            grid_spec=pltpu.PrefetchScalarGridSpec(
                num_scalar_prefetch=0,
                grid=(N,),
                in_specs=in_specs,
                out_specs=out_specs,
                scratch_shapes=[pltpu.VMEM((C, H + W), jnp.float32)],
            ),
            compiler_params=pltpu.CompilerParams(
                dimension_semantics=("parallel",),
                vmem_limit_bytes=vmem_limit),
        )(x2, *consts)

    try:
        out = run(True)
    except Exception:
        # Fallback for JAX versions whose Mosaic pipeliner rejects
        # pipeline_mode=pl.Buffered(1); semantics are identical, constants are
        # just double-buffered.
        out = run(False)
    return out.reshape(N, C, H, W)


def init_params(key, in_channels, out_channels, reduction=32):
    temp_c = max(8, in_channels // reduction)
    ks = jax.random.split(key, 6)

    def uni(k, shape, fan_in):
        bound = 1.0 / jnp.sqrt(float(fan_in))
        return jax.random.uniform(k, shape, jnp.float32, -bound, bound)

    return {
        # conv1: in_channels -> temp_c, 1x1
        "w1": uni(ks[0], (temp_c, in_channels), in_channels),
        "b1": uni(ks[1], (temp_c, 1), in_channels),
        # bn1 (eval-mode running stats), deterministic but non-trivial
        "gamma": (1.0 + 0.05 * jnp.arange(temp_c, dtype=jnp.float32)).reshape(temp_c, 1),
        "beta": (0.01 * jnp.arange(temp_c, dtype=jnp.float32)).reshape(temp_c, 1),
        "mean": (0.02 * jnp.arange(temp_c, dtype=jnp.float32)).reshape(temp_c, 1),
        "var": (1.0 + 0.03 * jnp.arange(temp_c, dtype=jnp.float32)).reshape(temp_c, 1),
        # conv2 / conv3: temp_c -> out_channels, 1x1
        "w2": uni(ks[2], (out_channels, temp_c), temp_c),
        "b2": uni(ks[3], (out_channels, 1), temp_c),
        "w3": uni(ks[4], (out_channels, temp_c), temp_c),
        "b3": uni(ks[5], (out_channels, 1), temp_c),
    }


def coord_attention_ref(x, p, eps=1e-5):
    """Plain-JAX reference mirroring the PyTorch forward (eval-mode BN)."""
    x_h = jnp.mean(x, axis=3)                                   # (N,C,H)
    x_w = jnp.mean(x, axis=2)                                   # (N,C,W)
    feat = jnp.concatenate([x_h, x_w], axis=2)                  # (N,C,H+W)
    y = jnp.einsum("tc,ncl->ntl", p["w1"], feat) + p["b1"][None]
    scale = p["gamma"] / jnp.sqrt(p["var"] + eps)
    y = (y - p["mean"][None]) * scale[None] + p["beta"][None]
    y = y * jnp.clip(y + 3.0, 0.0, 6.0) / 6.0                   # h_swish
    H = x.shape[2]
    y_h, y_w = y[:, :, :H], y[:, :, H:]
    out_h = jax.nn.sigmoid(jnp.einsum("ot,ntl->nol", p["w2"], y_h) + p["b2"][None])
    out_w = jax.nn.sigmoid(jnp.einsum("ot,ntl->nol", p["w3"], y_w) + p["b3"][None])
    return x * out_h[:, :, :, None] * out_w[:, :, None, :]


if __name__ == "__main__":
    key = jax.random.PRNGKey(0)
    k_x1, k_p1, k_x2, k_p2 = jax.random.split(key, 4)

    # Case 1: canonical small shape (single gating chunk inside the kernel).
    N, C, H, W = 2, 4, 16, 16
    x = jax.random.normal(k_x1, (N, C, H, W), jnp.float32)
    params = init_params(k_p1, in_channels=C, out_channels=C, reduction=32)
    out = jax.block_until_ready(coord_attention(x, params))
    ref = coord_attention_ref(x, params)
    assert out.shape == (N, C, H, W)
    # bf16 selection-matrix matmuls => deliberately loosened comparison bound.
    err = jnp.max(jnp.abs(out - ref) / (1.0 + jnp.abs(ref)))
    assert err < 2e-2, f"case 1 mismatch vs reference: {err}"

    # Case 2: exercises the chunked pooling / gating loops (HW=1024, 4 chunks).
    N2, C2, H2, W2 = 1, 8, 32, 32
    x_b = jax.random.normal(k_x2, (N2, C2, H2, W2), jnp.float32)
    params_b = init_params(k_p2, in_channels=C2, out_channels=C2, reduction=32)
    out_b = jax.block_until_ready(coord_attention(x_b, params_b, gating_chunk=256))
    ref_b = coord_attention_ref(x_b, params_b)
    assert out_b.shape == (N2, C2, H2, W2)
    err_b = jnp.max(jnp.abs(out_b - ref_b) / (1.0 + jnp.abs(ref_b)))
    assert err_b < 2e-2, f"case 2 mismatch vs reference: {err_b}"

    print("KERNEL_OK")
</pallas_src>

<mosaic_0001>
module attributes {stable_mosaic.version = 11 : i64} {
  func.func @_coord_attention_kernel(%arg0: i32, %arg1: memref<1x4x256xf32, #tpu.memory_space<vmem>>, %arg2: memref<256x32xbf16, #tpu.memory_space<vmem>>, %arg3: memref<16x256xbf16, #tpu.memory_space<vmem>>, %arg4: memref<16x256xbf16, #tpu.memory_space<vmem>>, %arg5: memref<1x32xf32, #tpu.memory_space<vmem>>, %arg6: memref<8x4xf32, #tpu.memory_space<vmem>>, %arg7: memref<8x1xf32, #tpu.memory_space<vmem>>, %arg8: memref<4x8xf32, #tpu.memory_space<vmem>>, %arg9: memref<4x1xf32, #tpu.memory_space<vmem>>, %arg10: memref<4x8xf32, #tpu.memory_space<vmem>>, %arg11: memref<4x1xf32, #tpu.memory_space<vmem>>, %arg12: memref<1x4x256xf32, #tpu.memory_space<vmem>>, %arg13: memref<4x32xf32, #tpu.memory_space<vmem>>) attributes {dimension_semantics = [#tpu.dimension_semantics<parallel>], iteration_bounds = array<i64: 2>, scalar_prefetch = 0 : i64, scratch_operands = 1 : i64, tpu.core_type = #tpu.core_type<tc>, window_params = [{transform_indices = @transform_0, window_bounds = array<i64: 1, 4, 256>}, {pipeline_mode = #tpu.pipeline_mode<synchronous>, transform_indices = @transform_1, window_bounds = array<i64: 256, 32>}, {pipeline_mode = #tpu.pipeline_mode<synchronous>, transform_indices = @transform_2, window_bounds = array<i64: 16, 256>}, {pipeline_mode = #tpu.pipeline_mode<synchronous>, transform_indices = @transform_3, window_bounds = array<i64: 16, 256>}, {pipeline_mode = #tpu.pipeline_mode<synchronous>, transform_indices = @transform_4, window_bounds = array<i64: 1, 32>}, {pipeline_mode = #tpu.pipeline_mode<synchronous>, transform_indices = @transform_5, window_bounds = array<i64: 8, 4>}, {pipeline_mode = #tpu.pipeline_mode<synchronous>, transform_indices = @transform_6, window_bounds = array<i64: 8, 1>}, {pipeline_mode = #tpu.pipeline_mode<synchronous>, transform_indices = @transform_7, window_bounds = array<i64: 4, 8>}, {pipeline_mode = #tpu.pipeline_mode<synchronous>, transform_indices = @transform_8, window_bounds = array<i64: 4, 1>}, {pipeline_mode = #tpu.pipeline_mode<synchronous>, transform_indices = @transform_9, window_bounds = array<i64: 4, 8>}, {pipeline_mode = #tpu.pipeline_mode<synchronous>, transform_indices = @transform_10, window_bounds = array<i64: 4, 1>}, {transform_indices = @transform_11, window_bounds = array<i64: 1, 4, 256>}]} {
    %cst = arith.constant 0.000000e+00 : f32
    %0 = vector.broadcast %cst : f32 to vector<4x32xf32>
    %c0 = arith.constant 0 : index
    %c0_0 = arith.constant 0 : index
    %1 = vector.load %arg13[%c0, %c0_0] : memref<4x32xf32, #tpu.memory_space<vmem>>, vector<4x32xf32>
    tpu.vector_store %arg13[%c0, %c0_0], %0 {strides = array<i32>} : memref<4x32xf32, #tpu.memory_space<vmem>>, vector<4x32xf32>,
    %c0_i32 = arith.constant 0 : i32
    %c1_i32 = arith.constant 1 : i32
    %2 = arith.muli %c0_i32, %c1_i32 : i32
    %c0_i32_1 = arith.constant 0 : i32
    %3 = arith.addi %c0_i32_1, %2 : i32
    %c256_i32 = arith.constant 256 : i32
    %4 = arith.muli %3, %c256_i32 : i32
    %5 = tpu.assume_multiple %4, 256 : i32
    %c0_2 = arith.constant 0 : index
    %c0_3 = arith.constant 0 : index
    %6 = arith.index_cast %5 : i32 to index
    %7 = vector.load %arg1[%c0_2, %c0_3, %6] : memref<1x4x256xf32, #tpu.memory_space<vmem>>, vector<1x4x256xf32>
    %8 = vector.shape_cast %7 : vector<1x4x256xf32> to vector<4x256xf32>
    %9 = arith.truncf %8 : vector<4x256xf32> to vector<4x256xbf16>
    %10 = arith.index_cast %5 : i32 to index
    %c0_4 = arith.constant 0 : index
    %11 = vector.load %arg2[%10, %c0_4] : memref<256x32xbf16, #tpu.memory_space<vmem>>, vector<256x32xbf16>
    %c0_5 = arith.constant 0 : index
    %c0_6 = arith.constant 0 : index
    %12 = vector.load %arg13[%c0_5, %c0_6] : memref<4x32xf32, #tpu.memory_space<vmem>>, vector<4x32xf32>
    %cst_7 = arith.constant dense<0.000000e+00> : vector<4x32xf32>
    %13 = tpu.matmul %9, %11, %cst_7 {dimension_numbers = #tpu.dot_dimension_numbers<[1], [0], [0], [1], [0, 0, 1, 1], [], []>} : vector<4x256xbf16>, vector<256x32xbf16>, vector<4x32xf32> -> vector<4x32xf32>
    %14 = arith.addf %12, %13 : vector<4x32xf32>
    %c0_8 = arith.constant 0 : index
    %c0_9 = arith.constant 0 : index
    %15 = vector.load %arg13[%c0_8, %c0_9] : memref<4x32xf32, #tpu.memory_space<vmem>>, vector<4x32xf32>
    tpu.vector_store %arg13[%c0_8, %c0_9], %14 {strides = array<i32>} : memref<4x32xf32, #tpu.memory_space<vmem>>, vector<4x32xf32>,
    %c1_i32_10 = arith.constant 1 : i32
    %c0_11 = arith.constant 0 : index
    %c0_12 = arith.constant 0 : index
    %16 = vector.load %arg13[%c0_11, %c0_12] : memref<4x32xf32, #tpu.memory_space<vmem>>, vector<4x32xf32>
    %c0_13 = arith.constant 0 : index
    %c0_14 = arith.constant 0 : index
    %17 = vector.load %arg5[%c0_13, %c0_14] : memref<1x32xf32, #tpu.memory_space<vmem>>, vector<1x32xf32>
    %18 = vector.broadcast %17 : vector<1x32xf32> to vector<4x32xf32>
    %19 = arith.mulf %16, %18 : vector<4x32xf32>
    %c0_15 = arith.constant 0 : index
    %c0_16 = arith.constant 0 : index
    %20 = vector.load %arg6[%c0_15, %c0_16] : memref<8x4xf32, #tpu.memory_space<vmem>>, vector<8x4xf32>
    %cst_17 = arith.constant dense<0.000000e+00> : vector<8x32xf32>
    %21 = tpu.matmul %20, %19, %cst_17 {dimension_numbers = #tpu.dot_dimension_numbers<[1], [0], [0], [1], [0, 0, 1, 1], [], []>} : vector<8x4xf32>, vector<4x32xf32>, vector<8x32xf32> -> vector<8x32xf32>
    %c0_18 = arith.constant 0 : index
    %c0_19 = arith.constant 0 : index
    %22 = vector.load %arg7[%c0_18, %c0_19] : memref<8x1xf32, #tpu.memory_space<vmem>>, vector<8x1xf32>
    %23 = vector.broadcast %22 : vector<8x1xf32> to vector<8x32xf32>
    %24 = arith.addf %21, %23 : vector<8x32xf32>
    %cst_20 = arith.constant 3.000000e+00 : f32
    %25 = vector.broadcast %cst_20 : f32 to vector<8x32xf32>
    %26 = arith.addf %24, %25 : vector<8x32xf32>
    %cst_21 = arith.constant 0.000000e+00 : f32
    %cst_22 = arith.constant 6.000000e+00 : f32
    %27 = vector.broadcast %cst_21 : f32 to vector<8x32xf32>
    %28 = arith.maximumf %27, %26 : vector<8x32xf32>
    %29 = vector.broadcast %cst_22 : f32 to vector<8x32xf32>
    %30 = arith.minimumf %29, %28 : vector<8x32xf32>
    %31 = arith.mulf %24, %30 : vector<8x32xf32>
    %cst_23 = arith.constant 0.166666672 : f32
    %32 = vector.broadcast %cst_23 : f32 to vector<8x32xf32>
    %33 = arith.mulf %31, %32 : vector<8x32xf32>
    %34 = vector.extract_strided_slice %33 {offsets = [0, 0], sizes = [8, 16], strides = [1, 1]} : vector<8x32xf32> to vector<8x16xf32>
    %35 = vector.extract_strided_slice %33 {offsets = [0, 16], sizes = [8, 16], strides = [1, 1]} : vector<8x32xf32> to vector<8x16xf32>
    %c0_24 = arith.constant 0 : index
    %c0_25 = arith.constant 0 : index
    %36 = vector.load %arg8[%c0_24, %c0_25] : memref<4x8xf32, #tpu.memory_space<vmem>>, vector<4x8xf32>
    %cst_26 = arith.constant dense<0.000000e+00> : vector<4x16xf32>
    %37 = tpu.matmul %36, %34, %cst_26 {dimension_numbers = #tpu.dot_dimension_numbers<[1], [0], [0], [1], [0, 0, 1, 1], [], []>} : vector<4x8xf32>, vector<8x16xf32>, vector<4x16xf32> -> vector<4x16xf32>
    %c0_27 = arith.constant 0 : index
    %c0_28 = arith.constant 0 : index
    %38 = vector.load %arg9[%c0_27, %c0_28] : memref<4x1xf32, #tpu.memory_space<vmem>>, vector<4x1xf32>
    %39 = vector.broadcast %38 : vector<4x1xf32> to vector<4x16xf32>
    %40 = arith.addf %37, %39 : vector<4x16xf32>
    %41 = arith.negf %40 : vector<4x16xf32>
    %42 = math.exp %41 : vector<4x16xf32>
    %cst_29 = arith.constant 1.000000e+00 : f32
    %43 = vector.broadcast %cst_29 : f32 to vector<4x16xf32>
    %44 = arith.addf %43, %42 : vector<4x16xf32>
    %45 = arith.divf %43, %44 : vector<4x16xf32>
    %c0_30 = arith.constant 0 : index
    %c0_31 = arith.constant 0 : index
    %46 = vector.load %arg10[%c0_30, %c0_31] : memref<4x8xf32, #tpu.memory_space<vmem>>, vector<4x8xf32>
    %cst_32 = arith.constant dense<0.000000e+00> : vector<4x16xf32>
    %47 = tpu.matmul %46, %35, %cst_32 {dimension_numbers = #tpu.dot_dimension_numbers<[1], [0], [0], [1], [0, 0, 1, 1], [], []>} : vector<4x8xf32>, vector<8x16xf32>, vector<4x16xf32> -> vector<4x16xf32>
    %c0_33 = arith.constant 0 : index
    %c0_34 = arith.constant 0 : index
    %48 = vector.load %arg11[%c0_33, %c0_34] : memref<4x1xf32, #tpu.memory_space<vmem>>, vector<4x1xf32>
    %49 = vector.broadcast %48 : vector<4x1xf32> to vector<4x16xf32>
    %50 = arith.addf %47, %49 : vector<4x16xf32>
    %51 = arith.negf %50 : vector<4x16xf32>
    %52 = math.exp %51 : vector<4x16xf32>
    %cst_35 = arith.constant 1.000000e+00 : f32
    %53 = vector.broadcast %cst_35 : f32 to vector<4x16xf32>
    %54 = arith.addf %53, %52 : vector<4x16xf32>
    %55 = arith.divf %53, %54 : vector<4x16xf32>
    %56 = arith.truncf %45 : vector<4x16xf32> to vector<4x16xbf16>
    %57 = arith.truncf %55 : vector<4x16xf32> to vector<4x16xbf16>
    %c0_i32_36 = arith.constant 0 : i32
    %c1_i32_37 = arith.constant 1 : i32
    %58 = arith.muli %c0_i32_36, %c1_i32_37 : i32
    %c0_i32_38 = arith.constant 0 : i32
    %59 = arith.addi %c0_i32_38, %58 : i32
    %c256_i32_39 = arith.constant 256 : i32
    %60 = arith.muli %59, %c256_i32_39 : i32
    %61 = tpu.assume_multiple %60, 256 : i32
    %c0_40 = arith.constant 0 : index
    %62 = arith.index_cast %61 : i32 to index
    %63 = vector.load %arg3[%c0_40, %62] : memref<16x256xbf16, #tpu.memory_space<vmem>>, vector<16x256xbf16>
    %cst_41 = arith.constant dense<0.000000e+00> : vector<4x256xf32>
    %64 = tpu.matmul %56, %63, %cst_41 {dimension_numbers = #tpu.dot_dimension_numbers<[1], [0], [0], [1], [0, 0, 1, 1], [], []>} : vector<4x16xbf16>, vector<16x256xbf16>, vector<4x256xf32> -> vector<4x256xf32>
    %c0_42 = arith.constant 0 : index
    %65 = arith.index_cast %61 : i32 to index
    %66 = vector.load %arg4[%c0_42, %65] : memref<16x256xbf16, #tpu.memory_space<vmem>>, vector<16x256xbf16>
    %cst_43 = arith.constant dense<0.000000e+00> : vector<4x256xf32>
    %67 = tpu.matmul %57, %66, %cst_43 {dimension_numbers = #tpu.dot_dimension_numbers<[1], [0], [0], [1], [0, 0, 1, 1], [], []>} : vector<4x16xbf16>, vector<16x256xbf16>, vector<4x256xf32> -> vector<4x256xf32>
    %c0_44 = arith.constant 0 : index
    %c0_45 = arith.constant 0 : index
    %68 = arith.index_cast %61 : i32 to index
    %69 = vector.load %arg1[%c0_44, %c0_45, %68] : memref<1x4x256xf32, #tpu.memory_space<vmem>>, vector<1x4x256xf32>
    %70 = vector.shape_cast %69 : vector<1x4x256xf32> to vector<4x256xf32>
    %71 = arith.mulf %70, %64 : vector<4x256xf32>
    %72 = arith.mulf %71, %67 : vector<4x256xf32>
    %c0_46 = arith.constant 0 : index
    %c0_47 = arith.constant 0 : index
    %73 = arith.index_cast %61 : i32 to index
    %74 = vector.load %arg12[%c0_46, %c0_47, %73] : memref<1x4x256xf32, #tpu.memory_space<vmem>>, vector<1x4x256xf32>
    %75 = vector.shape_cast %74 : vector<1x4x256xf32> to vector<4x256xf32>
    %76 = vector.shape_cast %72 : vector<4x256xf32> to vector<1x4x256xf32>
    tpu.vector_store %arg12[%c0_46, %c0_47, %73], %76 {strides = array<i32>} : memref<1x4x256xf32, #tpu.memory_space<vmem>>, vector<1x4x256xf32>,
    %c1_i32_48 = arith.constant 1 : i32
    return
  }
  func.func @transform_0(%arg0: i32) -> (i32, i32, i32) {
    %c0_i32 = arith.constant 0 : i32
    %c0_i32_0 = arith.constant 0 : i32
    %c0_i32_1 = arith.constant 0 : i32
    return %arg0, %c0_i32, %c0_i32_0 : i32, i32, i32
  }
  func.func @transform_1(%arg0: i32) -> (i32, i32) {
    %c0_i32 = arith.constant 0 : i32
    %c0_i32_0 = arith.constant 0 : i32
    %c0_i32_1 = arith.constant 0 : i32
    return %c0_i32, %c0_i32_0 : i32, i32
  }
  func.func @transform_2(%arg0: i32) -> (i32, i32) {
    %c0_i32 = arith.constant 0 : i32
    %c0_i32_0 = arith.constant 0 : i32
    %c0_i32_1 = arith.constant 0 : i32
    return %c0_i32, %c0_i32_0 : i32, i32
  }
  func.func @transform_3(%arg0: i32) -> (i32, i32) {
    %c0_i32 = arith.constant 0 : i32
    %c0_i32_0 = arith.constant 0 : i32
    %c0_i32_1 = arith.constant 0 : i32
    return %c0_i32, %c0_i32_0 : i32, i32
  }
  func.func @transform_4(%arg0: i32) -> (i32, i32) {
    %c0_i32 = arith.constant 0 : i32
    %c0_i32_0 = arith.constant 0 : i32
    %c0_i32_1 = arith.constant 0 : i32
    return %c0_i32, %c0_i32_0 : i32, i32
  }
  func.func @transform_5(%arg0: i32) -> (i32, i32) {
    %c0_i32 = arith.constant 0 : i32
    %c0_i32_0 = arith.constant 0 : i32
    %c0_i32_1 = arith.constant 0 : i32
    return %c0_i32, %c0_i32_0 : i32, i32
  }
  func.func @transform_6(%arg0: i32) -> (i32, i32) {
    %c0_i32 = arith.constant 0 : i32
    %c0_i32_0 = arith.constant 0 : i32
    %c0_i32_1 = arith.constant 0 : i32
    return %c0_i32, %c0_i32_0 : i32, i32
  }
  func.func @transform_7(%arg0: i32) -> (i32, i32) {
    %c0_i32 = arith.constant 0 : i32
    %c0_i32_0 = arith.constant 0 : i32
    %c0_i32_1 = arith.constant 0 : i32
    return %c0_i32, %c0_i32_0 : i32, i32
  }
  func.func @transform_8(%arg0: i32) -> (i32, i32) {
    %c0_i32 = arith.constant 0 : i32
    %c0_i32_0 = arith.constant 0 : i32
    %c0_i32_1 = arith.constant 0 : i32
    return %c0_i32, %c0_i32_0 : i32, i32
  }
  func.func @transform_9(%arg0: i32) -> (i32, i32) {
    %c0_i32 = arith.constant 0 : i32
    %c0_i32_0 = arith.constant 0 : i32
    %c0_i32_1 = arith.constant 0 : i32
    return %c0_i32, %c0_i32_0 : i32, i32
  }
  func.func @transform_10(%arg0: i32) -> (i32, i32) {
    %c0_i32 = arith.constant 0 : i32
    %c0_i32_0 = arith.constant 0 : i32
    %c0_i32_1 = arith.constant 0 : i32
    return %c0_i32, %c0_i32_0 : i32, i32
  }
  func.func @transform_11(%arg0: i32) -> (i32, i32, i32) {
    %c0_i32 = arith.constant 0 : i32
    %c0_i32_0 = arith.constant 0 : i32
    %c0_i32_1 = arith.constant 0 : i32
    return %arg0, %c0_i32, %c0_i32_0 : i32, i32, i32
  }
}

module attributes {stable_mosaic.version = 11 : i64} {
  func.func @_coord_attention_kernel(%arg0: i32, %arg1: memref<1x4x256xf32, #tpu.memory_space<vmem>>, %arg2: memref<256x32xbf16, #tpu.memory_space<vmem>>, %arg3: memref<16x256xbf16, #tpu.memory_space<vmem>>, %arg4: memref<16x256xbf16, #tpu.memory_space<vmem>>, %arg5: memref<1x32xf32, #tpu.memory_space<vmem>>, %arg6: memref<8x4xf32, #tpu.memory_space<vmem>>, %arg7: memref<8x1xf32, #tpu.memory_space<vmem>>, %arg8: memref<4x8xf32, #tpu.memory_space<vmem>>, %arg9: memref<4x1xf32, #tpu.memory_space<vmem>>, %arg10: memref<4x8xf32, #tpu.memory_space<vmem>>, %arg11: memref<4x1xf32, #tpu.memory_space<vmem>>, %arg12: memref<1x4x256xf32, #tpu.memory_space<vmem>>, %arg13: memref<4x32xf32, #tpu.memory_space<vmem>>) attributes {dimension_semantics = [#tpu.dimension_semantics<parallel>], iteration_bounds = array<i64: 2>, scalar_prefetch = 0 : i64, scratch_operands = 1 : i64, tpu.core_type = #tpu.core_type<tc>, window_params = [{transform_indices = @transform_0, window_bounds = array<i64: 1, 4, 256>}, {pipeline_mode = #tpu.pipeline_mode<synchronous>, transform_indices = @transform_1, window_bounds = array<i64: 256, 32>}, {pipeline_mode = #tpu.pipeline_mode<synchronous>, transform_indices = @transform_2, window_bounds = array<i64: 16, 256>}, {pipeline_mode = #tpu.pipeline_mode<synchronous>, transform_indices = @transform_3, window_bounds = array<i64: 16, 256>}, {pipeline_mode = #tpu.pipeline_mode<synchronous>, transform_indices = @transform_4, window_bounds = array<i64: 1, 32>}, {pipeline_mode = #tpu.pipeline_mode<synchronous>, transform_indices = @transform_5, window_bounds = array<i64: 8, 4>}, {pipeline_mode = #tpu.pipeline_mode<synchronous>, transform_indices = @transform_6, window_bounds = array<i64: 8, 1>}, {pipeline_mode = #tpu.pipeline_mode<synchronous>, transform_indices = @transform_7, window_bounds = array<i64: 4, 8>}, {pipeline_mode = #tpu.pipeline_mode<synchronous>, transform_indices = @transform_8, window_bounds = array<i64: 4, 1>}, {pipeline_mode = #tpu.pipeline_mode<synchronous>, transform_indices = @transform_9, window_bounds = array<i64: 4, 8>}, {pipeline_mode = #tpu.pipeline_mode<synchronous>, transform_indices = @transform_10, window_bounds = array<i64: 4, 1>}, {transform_indices = @transform_11, window_bounds = array<i64: 1, 4, 256>}]} {
    %cst = arith.constant 0.000000e+00 : f32
    %0 = vector.broadcast %cst : f32 to vector<4x32xf32>
    %c0 = arith.constant 0 : index
    %c0_0 = arith.constant 0 : index
    %1 = vector.load %arg13[%c0, %c0_0] : memref<4x32xf32, #tpu.memory_space<vmem>>, vector<4x32xf32>
    tpu.vector_store %arg13[%c0, %c0_0], %0 {strides = array<i32>} : memref<4x32xf32, #tpu.memory_space<vmem>>, vector<4x32xf32>,
    %c0_i32 = arith.constant 0 : i32
    %c1_i32 = arith.constant 1 : i32
    %2 = arith.muli %c0_i32, %c1_i32 : i32
    %c0_i32_1 = arith.constant 0 : i32
    %3 = arith.addi %c0_i32_1, %2 : i32
    %c256_i32 = arith.constant 256 : i32
    %4 = arith.muli %3, %c256_i32 : i32
    %5 = tpu.assume_multiple %4, 256 : i32
    %c0_2 = arith.constant 0 : index
    %c0_3 = arith.constant 0 : index
    %6 = arith.index_cast %5 : i32 to index
    %7 = vector.load %arg1[%c0_2, %c0_3, %6] : memref<1x4x256xf32, #tpu.memory_space<vmem>>, vector<1x4x256xf32>
    %8 = vector.shape_cast %7 : vector<1x4x256xf32> to vector<4x256xf32>
    %9 = arith.truncf %8 : vector<4x256xf32> to vector<4x256xbf16>
    %10 = arith.index_cast %5 : i32 to index
    %c0_4 = arith.constant 0 : index
    %11 = vector.load %arg2[%10, %c0_4] : memref<256x32xbf16, #tpu.memory_space<vmem>>, vector<256x32xbf16>
    %c0_5 = arith.constant 0 : index
    %c0_6 = arith.constant 0 : index
    %12 = vector.load %arg13[%c0_5, %c0_6] : memref<4x32xf32, #tpu.memory_space<vmem>>, vector<4x32xf32>
    %cst_7 = arith.constant dense<0.000000e+00> : vector<4x32xf32>
    %13 = tpu.matmul %9, %11, %cst_7 {dimension_numbers = #tpu.dot_dimension_numbers<[1], [0], [0], [1], [0, 0, 1, 1], [], []>} : vector<4x256xbf16>, vector<256x32xbf16>, vector<4x32xf32> -> vector<4x32xf32>
    %14 = arith.addf %12, %13 : vector<4x32xf32>
    %c0_8 = arith.constant 0 : index
    %c0_9 = arith.constant 0 : index
    %15 = vector.load %arg13[%c0_8, %c0_9] : memref<4x32xf32, #tpu.memory_space<vmem>>, vector<4x32xf32>
    tpu.vector_store %arg13[%c0_8, %c0_9], %14 {strides = array<i32>} : memref<4x32xf32, #tpu.memory_space<vmem>>, vector<4x32xf32>,
    %c1_i32_10 = arith.constant 1 : i32
    %c0_11 = arith.constant 0 : index
    %c0_12 = arith.constant 0 : index
    %16 = vector.load %arg13[%c0_11, %c0_12] : memref<4x32xf32, #tpu.memory_space<vmem>>, vector<4x32xf32>
    %c0_13 = arith.constant 0 : index
    %c0_14 = arith.constant 0 : index
    %17 = vector.load %arg5[%c0_13, %c0_14] : memref<1x32xf32, #tpu.memory_space<vmem>>, vector<1x32xf32>
    %18 = vector.broadcast %17 : vector<1x32xf32> to vector<4x32xf32>
    %19 = arith.mulf %16, %18 : vector<4x32xf32>
    %c0_15 = arith.constant 0 : index
    %c0_16 = arith.constant 0 : index
    %20 = vector.load %arg6[%c0_15, %c0_16] : memref<8x4xf32, #tpu.memory_space<vmem>>, vector<8x4xf32>
    %cst_17 = arith.constant dense<0.000000e+00> : vector<8x32xf32>
    %21 = tpu.matmul %20, %19, %cst_17 {dimension_numbers = #tpu.dot_dimension_numbers<[1], [0], [0], [1], [0, 0, 1, 1], [], []>} : vector<8x4xf32>, vector<4x32xf32>, vector<8x32xf32> -> vector<8x32xf32>
    %c0_18 = arith.constant 0 : index
    %c0_19 = arith.constant 0 : index
    %22 = vector.load %arg7[%c0_18, %c0_19] : memref<8x1xf32, #tpu.memory_space<vmem>>, vector<8x1xf32>
    %23 = vector.broadcast %22 : vector<8x1xf32> to vector<8x32xf32>
    %24 = arith.addf %21, %23 : vector<8x32xf32>
    %cst_20 = arith.constant 3.000000e+00 : f32
    %25 = vector.broadcast %cst_20 : f32 to vector<8x32xf32>
    %26 = arith.addf %24, %25 : vector<8x32xf32>
    %cst_21 = arith.constant 0.000000e+00 : f32
    %cst_22 = arith.constant 6.000000e+00 : f32
    %27 = vector.broadcast %cst_21 : f32 to vector<8x32xf32>
    %28 = arith.maximumf %27, %26 : vector<8x32xf32>
    %29 = vector.broadcast %cst_22 : f32 to vector<8x32xf32>
    %30 = arith.minimumf %29, %28 : vector<8x32xf32>
    %31 = arith.mulf %24, %30 : vector<8x32xf32>
    %cst_23 = arith.constant 0.166666672 : f32
    %32 = vector.broadcast %cst_23 : f32 to vector<8x32xf32>
    %33 = arith.mulf %31, %32 : vector<8x32xf32>
    %34 = vector.extract_strided_slice %33 {offsets = [0, 0], sizes = [8, 16], strides = [1, 1]} : vector<8x32xf32> to vector<8x16xf32>
    %35 = vector.extract_strided_slice %33 {offsets = [0, 16], sizes = [8, 16], strides = [1, 1]} : vector<8x32xf32> to vector<8x16xf32>
    %c0_24 = arith.constant 0 : index
    %c0_25 = arith.constant 0 : index
    %36 = vector.load %arg8[%c0_24, %c0_25] : memref<4x8xf32, #tpu.memory_space<vmem>>, vector<4x8xf32>
    %cst_26 = arith.constant dense<0.000000e+00> : vector<4x16xf32>
    %37 = tpu.matmul %36, %34, %cst_26 {dimension_numbers = #tpu.dot_dimension_numbers<[1], [0], [0], [1], [0, 0, 1, 1], [], []>} : vector<4x8xf32>, vector<8x16xf32>, vector<4x16xf32> -> vector<4x16xf32>
    %c0_27 = arith.constant 0 : index
    %c0_28 = arith.constant 0 : index
    %38 = vector.load %arg9[%c0_27, %c0_28] : memref<4x1xf32, #tpu.memory_space<vmem>>, vector<4x1xf32>
    %39 = vector.broadcast %38 : vector<4x1xf32> to vector<4x16xf32>
    %40 = arith.addf %37, %39 : vector<4x16xf32>
    %41 = arith.negf %40 : vector<4x16xf32>
    %42 = math.exp %41 : vector<4x16xf32>
    %cst_29 = arith.constant 1.000000e+00 : f32
    %43 = vector.broadcast %cst_29 : f32 to vector<4x16xf32>
    %44 = arith.addf %43, %42 : vector<4x16xf32>
    %45 = arith.divf %43, %44 : vector<4x16xf32>
    %c0_30 = arith.constant 0 : index
    %c0_31 = arith.constant 0 : index
    %46 = vector.load %arg10[%c0_30, %c0_31] : memref<4x8xf32, #tpu.memory_space<vmem>>, vector<4x8xf32>
    %cst_32 = arith.constant dense<0.000000e+00> : vector<4x16xf32>
    %47 = tpu.matmul %46, %35, %cst_32 {dimension_numbers = #tpu.dot_dimension_numbers<[1], [0], [0], [1], [0, 0, 1, 1], [], []>} : vector<4x8xf32>, vector<8x16xf32>, vector<4x16xf32> -> vector<4x16xf32>
    %c0_33 = arith.constant 0 : index
    %c0_34 = arith.constant 0 : index
    %48 = vector.load %arg11[%c0_33, %c0_34] : memref<4x1xf32, #tpu.memory_space<vmem>>, vector<4x1xf32>
    %49 = vector.broadcast %48 : vector<4x1xf32> to vector<4x16xf32>
    %50 = arith.addf %47, %49 : vector<4x16xf32>
    %51 = arith.negf %50 : vector<4x16xf32>
    %52 = math.exp %51 : vector<4x16xf32>
    %cst_35 = arith.constant 1.000000e+00 : f32
    %53 = vector.broadcast %cst_35 : f32 to vector<4x16xf32>
    %54 = arith.addf %53, %52 : vector<4x16xf32>
    %55 = arith.divf %53, %54 : vector<4x16xf32>
    %56 = arith.truncf %45 : vector<4x16xf32> to vector<4x16xbf16>
    %57 = arith.truncf %55 : vector<4x16xf32> to vector<4x16xbf16>
    %c0_i32_36 = arith.constant 0 : i32
    %c1_i32_37 = arith.constant 1 : i32
    %58 = arith.muli %c0_i32_36, %c1_i32_37 : i32
    %c0_i32_38 = arith.constant 0 : i32
    %59 = arith.addi %c0_i32_38, %58 : i32
    %c256_i32_39 = arith.constant 256 : i32
    %60 = arith.muli %59, %c256_i32_39 : i32
    %61 = tpu.assume_multiple %60, 256 : i32
    %c0_40 = arith.constant 0 : index
    %62 = arith.index_cast %61 : i32 to index
    %63 = vector.load %arg3[%c0_40, %62] : memref<16x256xbf16, #tpu.memory_space<vmem>>, vector<16x256xbf16>
    %cst_41 = arith.constant dense<0.000000e+00> : vector<4x256xf32>
    %64 = tpu.matmul %56, %63, %cst_41 {dimension_numbers = #tpu.dot_dimension_numbers<[1], [0], [0], [1], [0, 0, 1, 1], [], []>} : vector<4x16xbf16>, vector<16x256xbf16>, vector<4x256xf32> -> vector<4x256xf32>
    %c0_42 = arith.constant 0 : index
    %65 = arith.index_cast %61 : i32 to index
    %66 = vector.load %arg4[%c0_42, %65] : memref<16x256xbf16, #tpu.memory_space<vmem>>, vector<16x256xbf16>
    %cst_43 = arith.constant dense<0.000000e+00> : vector<4x256xf32>
    %67 = tpu.matmul %57, %66, %cst_43 {dimension_numbers = #tpu.dot_dimension_numbers<[1], [0], [0], [1], [0, 0, 1, 1], [], []>} : vector<4x16xbf16>, vector<16x256xbf16>, vector<4x256xf32> -> vector<4x256xf32>
    %c0_44 = arith.constant 0 : index
    %c0_45 = arith.constant 0 : index
    %68 = arith.index_cast %61 : i32 to index
    %69 = vector.load %arg1[%c0_44, %c0_45, %68] : memref<1x4x256xf32, #tpu.memory_space<vmem>>, vector<1x4x256xf32>
    %70 = vector.shape_cast %69 : vector<1x4x256xf32> to vector<4x256xf32>
    %71 = arith.mulf %70, %64 : vector<4x256xf32>
    %72 = arith.mulf %71, %67 : vector<4x256xf32>
    %c0_46 = arith.constant 0 : index
    %c0_47 = arith.constant 0 : index
    %73 = arith.index_cast %61 : i32 to index
    %74 = vector.load %arg12[%c0_46, %c0_47, %73] : memref<1x4x256xf32, #tpu.memory_space<vmem>>, vector<1x4x256xf32>
    %75 = vector.shape_cast %74 : vector<1x4x256xf32> to vector<4x256xf32>
    %76 = vector.shape_cast %72 : vector<4x256xf32> to vector<1x4x256xf32>
    tpu.vector_store %arg12[%c0_46, %c0_47, %73], %76 {strides = array<i32>} : memref<1x4x256xf32, #tpu.memory_space<vmem>>, vector<1x4x256xf32>,
    %c1_i32_48 = arith.constant 1 : i32
    return
  }
  func.func @transform_0(%arg0: i32) -> (i32, i32, i32) {
    %c0_i32 = arith.constant 0 : i32
    %c0_i32_0 = arith.constant 0 : i32
    %c0_i32_1 = arith.constant 0 : i32
    return %arg0, %c0_i32, %c0_i32_0 : i32, i32, i32
  }
  func.func @transform_1(%arg0: i32) -> (i32, i32) {
    %c0_i32 = arith.constant 0 : i32
    %c0_i32_0 = arith.constant 0 : i32
    %c0_i32_1 = arith.constant 0 : i32
    return %c0_i32, %c0_i32_0 : i32, i32
  }
  func.func @transform_2(%arg0: i32) -> (i32, i32) {
    %c0_i32 = arith.constant 0 : i32
    %c0_i32_0 = arith.constant 0 : i32
    %c0_i32_1 = arith.constant 0 : i32
    return %c0_i32, %c0_i32_0 : i32, i32
  }
  func.func @transform_3(%arg0: i32) -> (i32, i32) {
    %c0_i32 = arith.constant 0 : i32
    %c0_i32_0 = arith.constant 0 : i32
    %c0_i32_1 = arith.constant 0 : i32
    return %c0_i32, %c0_i32_0 : i32, i32
  }
  func.func @transform_4(%arg0: i32) -> (i32, i32) {
    %c0_i32 = arith.constant 0 : i32
    %c0_i32_0 = arith.constant 0 : i32
    %c0_i32_1 = arith.constant 0 : i32
    return %c0_i32, %c0_i32_0 : i32, i32
  }
  func.func @transform_5(%arg0: i32) -> (i32, i32) {
    %c0_i32 = arith.constant 0 : i32
    %c0_i32_0 = arith.constant 0 : i32
    %c0_i32_1 = arith.constant 0 : i32
    return %c0_i32, %c0_i32_0 : i32, i32
  }
  func.func @transform_6(%arg0: i32) -> (i32, i32) {
    %c0_i32 = arith.constant 0 : i32
    %c0_i32_0 = arith.constant 0 : i32
    %c0_i32_1 = arith.constant 0 : i32
    return %c0_i32, %c0_i32_0 : i32, i32
  }
  func.func @transform_7(%arg0: i32) -> (i32, i32) {
    %c0_i32 = arith.constant 0 : i32
    %c0_i32_0 = arith.constant 0 : i32
    %c0_i32_1 = arith.constant 0 : i32
    return %c0_i32, %c0_i32_0 : i32, i32
  }
  func.func @transform_8(%arg0: i32) -> (i32, i32) {
    %c0_i32 = arith.constant 0 : i32
    %c0_i32_0 = arith.constant 0 : i32
    %c0_i32_1 = arith.constant 0 : i32
    return %c0_i32, %c0_i32_0 : i32, i32
  }
  func.func @transform_9(%arg0: i32) -> (i32, i32) {
    %c0_i32 = arith.constant 0 : i32
    %c0_i32_0 = arith.constant 0 : i32
    %c0_i32_1 = arith.constant 0 : i32
    return %c0_i32, %c0_i32_0 : i32, i32
  }
  func.func @transform_10(%arg0: i32) -> (i32, i32) {
    %c0_i32 = arith.constant 0 : i32
    %c0_i32_0 = arith.constant 0 : i32
    %c0_i32_1 = arith.constant 0 : i32
    return %c0_i32, %c0_i32_0 : i32, i32
  }
  func.func @transform_11(%arg0: i32) -> (i32, i32, i32) {
    %c0_i32 = arith.constant 0 : i32
    %c0_i32_0 = arith.constant 0 : i32
    %c0_i32_1 = arith.constant 0 : i32
    return %arg0, %c0_i32, %c0_i32_0 : i32, i32, i32
  }
}

</mosaic_0001>

<bundles_post_ra>
// kernel: tpu_custom_call.1
= control target key start
LH: loop header
LB: loop body
LE: loop exit
PB: predicated region body
PF: predicated region fallthrough
CT: control target
= control target key end

     0   :  { %16 = vsyncpa [#allocation4], 0  ;;  %s1523_s0 = inlined_call_operand.vmem [shape: f32[2,4,256], index: 0, kind: input, shape index: {}]   ;;  %s1524_s1 = inlined_call_operand.vmem [shape: bf16[256,32], index: 1, kind: input, shape index: {}]   ;;  %s1525_s2 = inlined_call_operand.vmem [shape: bf16[16,256], index: 2, kind: input, shape index: {}]   ;;  %s1526_s3 = inlined_call_operand.vmem [shape: bf16[16,256], index: 3, kind: input, shape index: {}]   ;;  %s1527_s4 = inlined_call_operand.vmem [shape: f32[1,32], index: 4, kind: input, shape index: {}]   ;;  %s1528_s5 = inlined_call_operand.vmem [shape: f32[8,4], index: 5, kind: input, shape index: {}]   ;;  %s1529_s6 = inlined_call_operand.vmem [shape: f32[8,1], index: 6, kind: input, shape index: {}]   ;;  %s1530_s7 = inlined_call_operand.vmem [shape: f32[4,8], index: 7, kind: input, shape index: {}]   ;;  %s1531_s8 = inlined_call_operand.vmem [shape: f32[4,1], index: 8, kind: input, shape index: {}]   ;;  %s1532_s9 = inlined_call_operand.vmem [shape: f32[4,8], index: 9, kind: input, shape index: {}]   ;;  %s1533_s10 = inlined_call_operand.vmem [shape: f32[4,1], index: 10, kind: input, shape index: {}]   ;;  %s1534_s11 = inlined_call_operand.hbm [shape: f32[2,4,256], index: 11, kind: output, shape index: {}]  }
   0x1   :  { %18 = vsyncpa [#allocation4 + $0x1], 0  ;;  %s1331_s17 = smov 0   ;;  %s1333_s18 = smov 0  }
   0x2   :  { %s1335_s19 = smov 0   ;;  %s1337_s20 = smov 0  }
   0x3 LB: > { %1538 = sst [smem:[#allocation6_spill]] %s1260_s19  ;;  %s1352_s21 = sadd.s32 4294967295, %s1264_s20   ;;  %s1264_s20 = sphi %s1337_s20, %s1543_s20   ;;  %s1260_s19 = sphi %s1335_s19, %s1545_s19   ;;  %s1256_s18 = sphi %s1333_s18, %s1547_s18   ;;  %s1252_s17 = sphi %s1331_s17, %s1546_s17  }
   0x4   : > { %s1042_s22 = sadd.s32 4294967294, %s1264_s20   ;;  %s1356_s23 = sadd.s32 1, %s1264_s20  }
   0x5   : > { %1539 = sst [smem:[#allocation7_spill]] %s1356_s23  ;;  %s267_s24 = sadd.s32 1, %s1260_s19 }
   0x6   : > { %s264_s25 = ssub.s32 %s1264_s20, %s1356_s23  ;;  %p277_p0 = scmp.ne.s32.totalorder %s1260_s19, %s1256_s18 }
   0x7   : > { %p265_p1 = scmp.eq.s32.totalorder %s264_s25, 0  ;;  %p278_p2 = scmp.eq.s32.totalorder %s1352_s21, 1 }
   0x8   : > { %p283_p3 = scmp.ne.s32.totalorder %s1256_s18, %s1252_s17  ;;  %p284_p4 = scmp.eq.s32.totalorder %s1042_s22, 1 }
   0x9   : > { %s1367_s26 = scalar_select %p265_p1, %s1260_s19, %s267_s24  }
   0xa   : > { %p1369_p5 = por %p278_p2, %p277_p0  ;;  %p1373_p6 = por %p284_p4, %p283_p3 }
   0xb   : > { %1540 = sst [smem:[#allocation8_spill]] %s1367_s26  ;;  %p1045_p7 = scmp.ge.s32.totalorder %s1264_s20, 1 }
   0xc   : > { %p340_p8 = scmp.lt.s32.totalorder %s1264_s20, 3 }
   0xe   : > { %p341_p9 = pnand %p1045_p7, %p340_p8 }
   0xf   : > { %p380_p10 = scmp.lt.s32.totalorder (!%p341_p9), %s1352_s21, 1  ;;  %s377_s24 = sand.u32 (!%p341_p9), 1, %s1256_s18  }
  0x10   : > { %344 = sbr.rel (%p341_p9) target bundleno = 1026 (0x402), region = 64  ;;  %s1046_s25 = sshll.u32 (!%p341_p9), %s377_s24, 3 }
  0x11   : > { %s379_s12 = scalar_lea.vmem (!%p341_p9), [#allocation3], %s1046_s25  ;;  %s969_s19 = scalar_lea.sflag (!%p341_p9), [#allocation4], %s377_s24 }
  0x15   : > { %v1173_v0 = vld [vmem:[%s1524_s1 + $0x78] sm:$0xff]   ;;  %v1175_v2 = vld [vmem:[%s1524_s1 + $0x70] sm:$0xff]   ;;  %v1177_v4 = vld [vmem:[%s1524_s1 + $0x68] sm:$0xff]   ;;  %s381_s29 = scalar_select %p380_p10, %s1352_s21, 1  ;;  %vm386_vm0 = vcmask 257024   ;;  %v1266_v20 = vmov 0.0  }
  0x16   : > { %v1174_v1 = vld [vmem:[%s1524_s1 + $0x38] sm:$0xff]   ;;  %1085 = vmatprep.subr.bf16.mxu0 %v1173_v0  ;;  %v1176_v3 = vld [vmem:[%s1524_s1 + $0x30] sm:$0xff]   ;;  %v1178_v5 = vld [vmem:[%s1524_s1 + $0x28] sm:$0xff]   ;;  %387 = vst.msk [vmem:[#allocation2] sm:$0xf] %vm386_vm0, %v1266_v20  ;;  %1113 = vmatprep.subr.mxu1 %v1266_v20  ;;  %vm1267_vm1 = vmmov 0  }
  0x17   : > { %1086 = vmatpush3.bf16.msra.mxu0 %v1174_v1  ;;  %v1179_v6 = vld [vmem:[%s1524_s1 + $0x60] sm:$0xff]   ;;  %s1083_s15 = sshll.u32 %s381_s29, 3  ;;  %v1181_v8 = vld [vmem:[%s1524_s1 + $0x58] sm:$0xff]   ;;  %v1183_v10 = vld [vmem:[%s1524_s1 + $0x50] sm:$0xff]   ;;  %1115 = vmatprep.mubr.msk.f32.mxu1 %vm1267_vm1, %v1266_v20  ;;  %v1268_v22 = vmov 0   ;;  %vm585_vm2 = vcmask 1043456  }
  0x18   : > { %1087 = vmatprep.subr.bf16.mxu0 %v1175_v2  ;;  %v1180_v7 = vld [vmem:[%s1524_s1 + $0x20] sm:$0xff]   ;;  %s384_s30 = scalar_lea.vmem %s1523_s0, %s1083_s15  ;;  %v1182_v9 = vld [vmem:[%s1524_s1 + $0x18] sm:$0xff]   ;;  %v1184_v13 = vld [vmem:[%s1524_s1 + $0x10] sm:$0xff]   ;;  %1171 = vset.pattern.permute.xlu0 %v1268_v22  ;;  %vm581_vm3 = vcmask 31744   ;;  %vm671_vm4 = vcmask 64512   ;;  %vm855_vm5 = vcmask 130048  }
  0x19   : > { %v1417_v11 = vld [vmem:[%s384_s30] sm:$0xff]  ;;  %v1185_v15 = vld [vmem:[%s1524_s1 + $0x48] sm:$0xff]   ;;  %1172 = vset.pattern.permute.xlu1 %v1268_v22  ;;  %s1269_s30 = smov 112   ;;  %s983_s29 = sshll.u32 %s379_s12, 4  ;;  %s984_s29 = int_to_ptr.vmem [resolvable:$true] %s983_s29 }
  0x1a   : > { %v390_v12 = vcombine.high %v1417_v11, %v1417_v11  ;;  %v1186_v16 = vld [vmem:[%s1524_s1 + $0x8] sm:$0xff]   ;;  %v1187_v17 = vld [vmem:[%s1524_s1 + $0x40] sm:$0xff]   ;;  %v392_v19 = vpack.c.bf16 %v1417_v11, %v1417_v11  ;;  %s1204_s23 = scalar_lea.vmem %s984_s29, 128 }
  0x1b   : > { %1088 = vmatpush3.bf16.msra.mxu0 %v1176_v3  ;;  %v1188_v18 = vld [vmem:[%s1524_s1] sm:$0xff]   ;;  %p1205_p11 = scmp.ne.s32.totalorder %s984_s29, %s1204_s23 }
  0x1c   : > { %1089 = vmatprep.subr.bf16.mxu0 %v1177_v4  ;;  %v393_v14 = vpack.c.bf16 %v390_v12, %v390_v12  ;;  %v575_v21 = vld [vmem:[%s1529_s6] sm:$0xff] }
  0x1d   : > { %578 = vperm.xlu0 %1171, %v575_v21   ;;  %v426_v24 = vld [vmem:[#allocation2] sm:$0xf]  ;;  %v1192_v53 = vld [vmem:[%s1525_s2 + $0x4] ss:$8 sps:$4 sm:$0xff]   ;;  %p1206_p12 = pnand %p1205_p11, %p1369_p5 }
  0x1e   : > { %555 = vmatprep.mubr.bf16.mxu0 %v393_v14  ;;  %v1065_v30 = vld [vmem:[%s1527_s4] ss:$0 sm:$0xff]  ;;  %v1195_v56 = vld [vmem:[%s1526_s3 + $0x4] ss:$8 sps:$4 sm:$0xff]  }
  0x1f   : > { %1090 = vmatpush3.bf16.msra.mxu0 %v1178_v5  ;;  %v574_v33 = vld [vmem:[%s1528_s5] sm:$0xff]  ;;  %p1207_p13 = pneg %p1206_p12 }
  0x20   : > { %1091 = vmatprep.subr.bf16.mxu0 %v1179_v6  ;;  %v665_v37 = vld [vmem:[%s1531_s8] sm:$0xf] }
  0x21   : > { %668 = vperm.xlu1 %1172, %v665_v37   ;;  %v752_v40 = vld [vmem:[%s1533_s10] sm:$0xf] }
  0x22   : > { %v664_v45 = vld [vmem:[%s1530_s7] sm:$0xf] }
  0x23   : > { %1092 = vmatpush3.bf16.msra.mxu0 %v1180_v7  ;;  %v751_v46 = vld [vmem:[%s1532_s9] sm:$0xf] }
  0x24   : > { %1093 = vmatprep.subr.bf16.mxu0 %v1181_v8  ;;  %v1190_v54 = vld [vmem:[%s1525_s2] ss:$8 sps:$4 sm:$0xff]  }
  0x25   : > { %755 = vperm.xlu1 %1172, %v752_v40   ;;  %v1193_v59 = vld [vmem:[%s1526_s3] ss:$8 sps:$4 sm:$0xff]  }
  0x27   : > { %1094 = vmatpush3.bf16.msra.mxu0 %v1182_v9 }
  0x28   : > { %1095 = vmatprep.subr.bf16.mxu0 %v1183_v10 }
  0x2b   : > { %1096 = vmatpush3.bf16.msra.mxu0 %v1184_v13 }
  0x2c   : > { %1097 = vmatprep.subr.bf16.mxu0 %v1185_v15 }
  0x2f   : > { %1098 = vmatpush3.bf16.msra.mxu0 %v1186_v16 }
  0x30   : > { %1099 = vmatprep.subr.bf16.mxu0 %v1187_v17 }
  0x33   : > { %1100 = vmatpush3.bf16.msra.mxu0 %v1188_v18 }
  0x36   : > { %556 = vmatmul.mubr.bf16.vlgmr.msra.gmra.mxu0 %v392_v19 }
  0x98   : > { %v579_v34 = vpop.permute.xlu0 %578 }
  0x9c   : > { %v669_v48 = vpop.permute.xlu1 %668 }
  0xa0   : > { %v756_v61 = vpop.permute.xlu1 %755 }
  0xf6   : > { %v1101_v23 = vpop.f32.mrf.mxu0 }
  0xf8   : > { %v1102_v25 = vpop.f32.mrf.mxu0 }
  0xf9   : > { %v1103_v26 = vadd.f32 %v1102_v25, %v1101_v23 }
  0xfa   : > { %v1104_v27 = vpop.f32.mrf.mxu0 }
  0xfb   : > { %v563_v28 = vadd.f32 %v1103_v26, %v426_v24 }
  0xfc   : > { %v1105_v29 = vpop.f32.mrf.mxu0 }
  0xfd   : > { %564 = vst.msk [vmem:[#allocation2] sm:$0xf] %vm386_vm0, %v563_v28 }
 0x104   : > { %v565_v31 = vld [vmem:[#allocation2] sm:$0xf] }
 0x105   : > { %v573_v32 = vmul.f32 %v1065_v30, %v565_v31 }
 0x107   : > { %1114 = vmatpush3.msk.msra.mxu1 %vm585_vm2, %v573_v32 }
 0x108   : > { %1116 = vmatmul.mubr.msk.f32.vlgmr.msra.gmra.mxu1 %vm581_vm3, %v574_v33  ;;  %1118 = vmatprep.subr.mxu1 %v1266_v20 }
 0x109   : > { %1120 = vmatprep.mubr.msk.f32.mxu1 %vm1267_vm1, %v1266_v20 }
 0x1c8   : > { %v655_v35 = vpop.f32.mrf.mxu1 }
 0x1c9   : > { %v656_v36 = vadd.f32 %v655_v35, %v579_v34 }
 0x1ca   : > { %v1117_v38 = vpop.f32.mrf.mxu1 }
 0x1cb   : > { %v659_v39 = vadd.f32 3.0, %v656_v36 }
 0x1cd   : > { %v660_v41 = vmax.f32 %v659_v39, 0.0 }
 0x1cf   : > { %v661_v42 = vmin.f32 %v660_v41, 6.0 }
 0x1d1   : > { %v662_v43 = vmul.f32 %v661_v42, %v656_v36 }
 0x1d3   : > { %v663_v44 = vmul.f32 0.16666667, %v662_v43 }
 0x1d5   : > { %759 = vrot.lane.b32.xlu0 %v663_v44, %s1269_s30  ;;  %1119 = vmatpush3.msra.mxu1 %v663_v44  ;;  %s1084_s30 = sshll.u32 %s1352_s21, 7  ;;  %s1270_s21 = smov [#allocation3]  }
 0x1d6   : > { %1121 = vmatmul.mubr.msk.f32.vlgmr.msra.gmra.mxu1 %vm671_vm4, %v664_v45  ;;  %1123 = vmatprep.subr.mxu1 %v1266_v20  ;;  %s1488_s16 = scalar_lea.hbm %s1534_s11, %s1084_s30  ;;  %s1208_s26 = sshll.u32 %s1270_s21, 4  ;;  %s1209_s26 = int_to_ptr.vmem [resolvable:$false] %s1208_s26 }
 0x1d7   : > { %1125 = vmatprep.mubr.msk.f32.mxu1 %vm1267_vm1, %v1266_v20  ;;  %s1210_s15 = scalar_lea.vmem %s1209_s26, 256  ;;  %p1211_p0 = scmp.lt.s32.totalorder %s984_s29, %s1209_s26 }
 0x1d8   : > { %p1212_p1 = scmp.lt.s32.totalorder %s1210_s15, %s1204_s23 }
 0x1da   : > { %p1213_p2 = por %p1212_p1, %p1211_p0 }
 0x1dc   : > { %p1214_p3 = pnand %p1213_p2, %p1207_p13 }
 0x247   : > { %v760_v47 = vpop.permute.xlu0 %759 }
 0x248   : > { %1124 = vmatpush3.msra.mxu1 %v760_v47 }
 0x249   : > { %1126 = vmatmul.mubr.msk.f32.vlgmr.msra.gmra.mxu1 %vm671_vm4, %v751_v46  ;;  %873 = vmatprep.subr.bf16.mxu1 %v1192_v53 }
 0x24a   : > { %891 = vmatprep.mubr.bf16.mxu1 %v1268_v22  ;;  %874 = vmatpush1.bf16.msra.mxu1 %v1190_v54 }
 0x24b   : > { %929 = vmatprep.subr.bf16.mxu1 %v1195_v56 }
 0x296   : > { %v741_v49 = vpop.f32.mrf.mxu1 }
 0x297   : > { %v742_v50 = vadd.f32 %v741_v49, %v669_v48 }
 0x298   : > { %v1122_v51 = vpop.f32.mrf.mxu1 }
 0x299   : > { %v1069_v52 = vmul.f32 -1.442695, %v742_v50 }
 0x29b   : > { %1196 = vpow2.f32 %v1069_v52 }
 0x2a8   : > { %v1197_v55 = vpop.eup %1196 }
 0x2a9   : > { %v748_v57 = vadd.f32 1.0, %v1197_v55 }
 0x2ab   : > { %1198 = vrcp.f32 %v748_v57 }
 0x2b8   : > { %v1199_v58 = vpop.eup %1198 }
 0x2b9   : > { %v841_v60 = vpack.c.bf16 %v1199_v58, %v1199_v58 }
 0x2bb   : > { %1074 = vmatmul.mubr.msk.bf16.vlgmr.msra.gmra.mxu1 %vm855_vm5, %v841_v60 }
 0x2bc   : > { %930 = vmatpush1.bf16.msra.mxu1 %v1193_v59  ;;  %947 = vmatprep.mubr.bf16.mxu1 %v1268_v22 }
 0x309   : > { %v831_v62 = vpop.f32.mrf.mxu1 }
 0x30a   : > { %v832_v63 = vadd.f32 %v831_v62, %v756_v61 }
 0x30b   : > { %v1127_v0 = vpop.f32.mrf.mxu1 }
 0x30c   : > { %v1071_v1 = vmul.f32 -1.442695, %v832_v63 }
 0x30e   : > { %1200 = vpow2.f32 %v1071_v1 }
 0x31b   : > { %v1201_v2 = vpop.eup %1200 }
 0x31c   : > { %v838_v3 = vadd.f32 1.0, %v1201_v2 }
 0x31e   : > { %1202 = vrcp.f32 %v838_v3 }
 0x32b   : > { %v1203_v4 = vpop.eup %1202 }
 0x32c   : > { %v842_v5 = vpack.c.bf16 %v1203_v4, %v1203_v4 }
 0x32e   : > { %1077 = vmatmul.mubr.msk.bf16.vlgmr.msra.gmra.mxu1 %vm855_vm5, %v842_v5 }
 0x37b   : > { %v893_v6 = vpop.f32.mrf.mxu1 }
 0x37d   : > { %v895_v7 = vpop.f32.mrf.mxu1 }
 0x37e   : > { %v959_v8 = vcombine.low %v893_v6, %v895_v7 }
 0x37f   : > { %v897_v9 = vpop.f32.mrf.mxu1 }
 0x380   : > { %v961_v14 = vmul.f32 %v959_v8, %v1417_v11 }
 0x381   : > { %v898_v10 = vpop.f32.mrf.mxu1 }
 0x3ee   : > { %v949_v12 = vpop.f32.mrf.mxu1 }
 0x3f0   : > { %v951_v13 = vpop.f32.mrf.mxu1 }
 0x3f1   : > { %v964_v15 = vcombine.low %v949_v12, %v951_v13 }
 0x3f2   : > { %v953_v16 = vpop.f32.mrf.mxu1 }
 0x3f3   : > { %v966_v17 = vmul.f32 %v964_v15, %v961_v14 }
 0x3f4   : > { %v954_v18 = vpop.f32.mrf.mxu1 }
 0x3f5   : > { %967 = vst [vmem:[%s379_s12] sm:$0xff] %v966_v17 }
 0x3f6   : > { %1217 = shalt.err (!%p1214_p3)
}
 0x3f7   : > { %s1218_s22 = scalar_lea.hbm %s1488_s16, 128  ;;  %s1222_s30 = scalar_lea.hbm %s1534_s11, 256 }
 0x3f8   : > { %p1219_p4 = scmp.ne.s32.totalorder %s1488_s16, %s1218_s22  ;;  %p1223_p9 = scmp.lt.s32.totalorder %s1488_s16, %s1534_s11 }
 0x3f9   : > { %p1224_p10 = scmp.lt.s32.totalorder %s1222_s30, %s1218_s22 }
 0x3fa   : > { %p1220_p7 = pnand %p1219_p4, %p1369_p5 }
 0x3fb   : > { %p1225_p11 = por %p1224_p10, %p1223_p9 }
 0x3fc   : > { %p1221_p8 = pneg %p1220_p7 }
 0x3fe   : > { %p1226_p12 = pnand %p1225_p11, %p1221_p8 }
 0x400   : > { %1229 = shalt.err (!%p1226_p12)
}
 0x401   : > { %1128 = dma.vmem_to_hbm [thread:$0]  (%p1369_p5), %s984_s29, 128, %s1488_s16, %s969_s19  }
 0x402 PF: > { %p1134_p13 = scmp.ge.s32.totalorder %s1264_s20, 2  ;;  %s995_s14 = sand.u32 1, %s1252_s17  }
 0x403   : > { %s996_s23 = scalar_lea.sflag [#allocation4], %s995_s14 }
 0x404   : > { %p1131_p0 = pnand %p1134_p13, %p1373_p6 }
 0x406   : > { %p1132_p1 = pneg %p1131_p0 }
 0x408   : > { %1247 = dma.done.wait (%p1132_p1), %s996_s23, 128  }
 0x409   : > { %1249 = vsyncadd (%p1132_p1), %s996_s23, 4294967168  ;;  %s1543_s20 = sld [smem:[#allocation7_spill]]  ;;  %s1546_s17 = smov %s1256_s18 }
 0x40a   : > { %s1544_s21 = sld [smem:[#allocation6_spill]] }
 0x40b   : > { %s1545_s19 = sld [smem:[#allocation8_spill]] }
 0x40f   : > { %p21_p2 = scmp.ge.s32.totalorder %s1543_s20, 4  }
 0x410   : > { %s1547_s18 = smov %s1544_s21 }
 0x411   :  { %23 = sbr.rel (!%p21_p2) target bundleno = 3 (0x3), region = 99 }
 0x416   :  { %1001 = vsyncpa [#allocation4], 1 }
 0x417   :  { %1003 = vsyncpa [#allocation4 + $0x1], 1 }

// kernel: tpu_custom_call.1
= control target key start
LH: loop header
LB: loop body
LE: loop exit
PB: predicated region body
PF: predicated region fallthrough
CT: control target
= control target key end

     0   :  { %16 = vsyncpa [#allocation4], 0  ;;  %s1523_s0 = inlined_call_operand.vmem [shape: f32[2,4,256], index: 0, kind: input, shape index: {}]   ;;  %s1524_s1 = inlined_call_operand.vmem [shape: bf16[256,32], index: 1, kind: input, shape index: {}]   ;;  %s1525_s2 = inlined_call_operand.vmem [shape: bf16[16,256], index: 2, kind: input, shape index: {}]   ;;  %s1526_s3 = inlined_call_operand.vmem [shape: bf16[16,256], index: 3, kind: input, shape index: {}]   ;;  %s1527_s4 = inlined_call_operand.vmem [shape: f32[1,32], index: 4, kind: input, shape index: {}]   ;;  %s1528_s5 = inlined_call_operand.vmem [shape: f32[8,4], index: 5, kind: input, shape index: {}]   ;;  %s1529_s6 = inlined_call_operand.vmem [shape: f32[8,1], index: 6, kind: input, shape index: {}]   ;;  %s1530_s7 = inlined_call_operand.vmem [shape: f32[4,8], index: 7, kind: input, shape index: {}]   ;;  %s1531_s8 = inlined_call_operand.vmem [shape: f32[4,1], index: 8, kind: input, shape index: {}]   ;;  %s1532_s9 = inlined_call_operand.vmem [shape: f32[4,8], index: 9, kind: input, shape index: {}]   ;;  %s1533_s10 = inlined_call_operand.vmem [shape: f32[4,1], index: 10, kind: input, shape index: {}]   ;;  %s1534_s11 = inlined_call_operand.hbm [shape: f32[2,4,256], index: 11, kind: output, shape index: {}]  }
   0x1   :  { %18 = vsyncpa [#allocation4 + $0x1], 0  ;;  %s1331_s17 = smov 0   ;;  %s1333_s18 = smov 0  }
   0x2   :  { %s1335_s19 = smov 0   ;;  %s1337_s20 = smov 0  }
   0x3 LB: > { %1538 = sst [smem:[#allocation6_spill]] %s1260_s19  ;;  %s1352_s21 = sadd.s32 4294967295, %s1264_s20   ;;  %s1264_s20 = sphi %s1337_s20, %s1543_s20   ;;  %s1260_s19 = sphi %s1335_s19, %s1545_s19   ;;  %s1256_s18 = sphi %s1333_s18, %s1547_s18   ;;  %s1252_s17 = sphi %s1331_s17, %s1546_s17  }
   0x4   : > { %s1042_s22 = sadd.s32 4294967294, %s1264_s20   ;;  %s1356_s23 = sadd.s32 1, %s1264_s20  }
   0x5   : > { %1539 = sst [smem:[#allocation7_spill]] %s1356_s23  ;;  %s267_s24 = sadd.s32 1, %s1260_s19 }
   0x6   : > { %s264_s25 = ssub.s32 %s1264_s20, %s1356_s23  ;;  %p277_p0 = scmp.ne.s32.totalorder %s1260_s19, %s1256_s18 }
   0x7   : > { %p265_p1 = scmp.eq.s32.totalorder %s264_s25, 0  ;;  %p278_p2 = scmp.eq.s32.totalorder %s1352_s21, 1 }
   0x8   : > { %p283_p3 = scmp.ne.s32.totalorder %s1256_s18, %s1252_s17  ;;  %p284_p4 = scmp.eq.s32.totalorder %s1042_s22, 1 }
   0x9   : > { %s1367_s26 = scalar_select %p265_p1, %s1260_s19, %s267_s24  }
   0xa   : > { %p1369_p5 = por %p278_p2, %p277_p0  ;;  %p1373_p6 = por %p284_p4, %p283_p3 }
   0xb   : > { %1540 = sst [smem:[#allocation8_spill]] %s1367_s26  ;;  %p1045_p7 = scmp.ge.s32.totalorder %s1264_s20, 1 }
   0xc   : > { %p340_p8 = scmp.lt.s32.totalorder %s1264_s20, 3 }
   0xe   : > { %p341_p9 = pnand %p1045_p7, %p340_p8 }
   0xf   : > { %p380_p10 = scmp.lt.s32.totalorder (!%p341_p9), %s1352_s21, 1  ;;  %s377_s24 = sand.u32 (!%p341_p9), 1, %s1256_s18  }
  0x10   : > { %344 = sbr.rel (%p341_p9) target bundleno = 1026 (0x402), region = 64  ;;  %s1046_s25 = sshll.u32 (!%p341_p9), %s377_s24, 3 }
  0x11   : > { %s379_s12 = scalar_lea.vmem (!%p341_p9), [#allocation3], %s1046_s25  ;;  %s969_s19 = scalar_lea.sflag (!%p341_p9), [#allocation4], %s377_s24 }
  0x15   : > { %v1173_v0 = vld [vmem:[%s1524_s1 + $0x78] sm:$0xff]   ;;  %v1175_v2 = vld [vmem:[%s1524_s1 + $0x70] sm:$0xff]   ;;  %v1177_v4 = vld [vmem:[%s1524_s1 + $0x68] sm:$0xff]   ;;  %s381_s29 = scalar_select %p380_p10, %s1352_s21, 1  ;;  %vm386_vm0 = vcmask 257024   ;;  %v1266_v20 = vmov 0.0  }
  0x16   : > { %v1174_v1 = vld [vmem:[%s1524_s1 + $0x38] sm:$0xff]   ;;  %1085 = vmatprep.subr.bf16.mxu0 %v1173_v0  ;;  %v1176_v3 = vld [vmem:[%s1524_s1 + $0x30] sm:$0xff]   ;;  %v1178_v5 = vld [vmem:[%s1524_s1 + $0x28] sm:$0xff]   ;;  %387 = vst.msk [vmem:[#allocation2] sm:$0xf] %vm386_vm0, %v1266_v20  ;;  %1113 = vmatprep.subr.mxu1 %v1266_v20  ;;  %vm1267_vm1 = vmmov 0  }
  0x17   : > { %1086 = vmatpush3.bf16.msra.mxu0 %v1174_v1  ;;  %v1179_v6 = vld [vmem:[%s1524_s1 + $0x60] sm:$0xff]   ;;  %s1083_s15 = sshll.u32 %s381_s29, 3  ;;  %v1181_v8 = vld [vmem:[%s1524_s1 + $0x58] sm:$0xff]   ;;  %v1183_v10 = vld [vmem:[%s1524_s1 + $0x50] sm:$0xff]   ;;  %1115 = vmatprep.mubr.msk.f32.mxu1 %vm1267_vm1, %v1266_v20  ;;  %v1268_v22 = vmov 0   ;;  %vm585_vm2 = vcmask 1043456  }
  0x18   : > { %1087 = vmatprep.subr.bf16.mxu0 %v1175_v2  ;;  %v1180_v7 = vld [vmem:[%s1524_s1 + $0x20] sm:$0xff]   ;;  %s384_s30 = scalar_lea.vmem %s1523_s0, %s1083_s15  ;;  %v1182_v9 = vld [vmem:[%s1524_s1 + $0x18] sm:$0xff]   ;;  %v1184_v13 = vld [vmem:[%s1524_s1 + $0x10] sm:$0xff]   ;;  %1171 = vset.pattern.permute.xlu0 %v1268_v22  ;;  %vm581_vm3 = vcmask 31744   ;;  %vm671_vm4 = vcmask 64512   ;;  %vm855_vm5 = vcmask 130048  }
  0x19   : > { %v1417_v11 = vld [vmem:[%s384_s30] sm:$0xff]  ;;  %v1185_v15 = vld [vmem:[%s1524_s1 + $0x48] sm:$0xff]   ;;  %1172 = vset.pattern.permute.xlu1 %v1268_v22  ;;  %s1269_s30 = smov 112   ;;  %s983_s29 = sshll.u32 %s379_s12, 4  ;;  %s984_s29 = int_to_ptr.vmem [resolvable:$true] %s983_s29 }
  0x1a   : > { %v390_v12 = vcombine.high %v1417_v11, %v1417_v11  ;;  %v1186_v16 = vld [vmem:[%s1524_s1 + $0x8] sm:$0xff]   ;;  %v1187_v17 = vld [vmem:[%s1524_s1 + $0x40] sm:$0xff]   ;;  %v392_v19 = vpack.c.bf16 %v1417_v11, %v1417_v11  ;;  %s1204_s23 = scalar_lea.vmem %s984_s29, 128 }
  0x1b   : > { %1088 = vmatpush3.bf16.msra.mxu0 %v1176_v3  ;;  %v1188_v18 = vld [vmem:[%s1524_s1] sm:$0xff]   ;;  %p1205_p11 = scmp.ne.s32.totalorder %s984_s29, %s1204_s23 }
  0x1c   : > { %1089 = vmatprep.subr.bf16.mxu0 %v1177_v4  ;;  %v393_v14 = vpack.c.bf16 %v390_v12, %v390_v12  ;;  %v575_v21 = vld [vmem:[%s1529_s6] sm:$0xff] }
  0x1d   : > { %578 = vperm.xlu0 %1171, %v575_v21   ;;  %v426_v24 = vld [vmem:[#allocation2] sm:$0xf]  ;;  %v1192_v53 = vld [vmem:[%s1525_s2 + $0x4] ss:$8 sps:$4 sm:$0xff]   ;;  %p1206_p12 = pnand %p1205_p11, %p1369_p5 }
  0x1e   : > { %555 = vmatprep.mubr.bf16.mxu0 %v393_v14  ;;  %v1065_v30 = vld [vmem:[%s1527_s4] ss:$0 sm:$0xff]  ;;  %v1195_v56 = vld [vmem:[%s1526_s3 + $0x4] ss:$8 sps:$4 sm:$0xff]  }
  0x1f   : > { %1090 = vmatpush3.bf16.msra.mxu0 %v1178_v5  ;;  %v574_v33 = vld [vmem:[%s1528_s5] sm:$0xff]  ;;  %p1207_p13 = pneg %p1206_p12 }
  0x20   : > { %1091 = vmatprep.subr.bf16.mxu0 %v1179_v6  ;;  %v665_v37 = vld [vmem:[%s1531_s8] sm:$0xf] }
  0x21   : > { %668 = vperm.xlu1 %1172, %v665_v37   ;;  %v752_v40 = vld [vmem:[%s1533_s10] sm:$0xf] }
  0x22   : > { %v664_v45 = vld [vmem:[%s1530_s7] sm:$0xf] }
  0x23   : > { %1092 = vmatpush3.bf16.msra.mxu0 %v1180_v7  ;;  %v751_v46 = vld [vmem:[%s1532_s9] sm:$0xf] }
  0x24   : > { %1093 = vmatprep.subr.bf16.mxu0 %v1181_v8  ;;  %v1190_v54 = vld [vmem:[%s1525_s2] ss:$8 sps:$4 sm:$0xff]  }
  0x25   : > { %755 = vperm.xlu1 %1172, %v752_v40   ;;  %v1193_v59 = vld [vmem:[%s1526_s3] ss:$8 sps:$4 sm:$0xff]  }
  0x27   : > { %1094 = vmatpush3.bf16.msra.mxu0 %v1182_v9 }
  0x28   : > { %1095 = vmatprep.subr.bf16.mxu0 %v1183_v10 }
  0x2b   : > { %1096 = vmatpush3.bf16.msra.mxu0 %v1184_v13 }
  0x2c   : > { %1097 = vmatprep.subr.bf16.mxu0 %v1185_v15 }
  0x2f   : > { %1098 = vmatpush3.bf16.msra.mxu0 %v1186_v16 }
  0x30   : > { %1099 = vmatprep.subr.bf16.mxu0 %v1187_v17 }
  0x33   : > { %1100 = vmatpush3.bf16.msra.mxu0 %v1188_v18 }
  0x36   : > { %556 = vmatmul.mubr.bf16.vlgmr.msra.gmra.mxu0 %v392_v19 }
  0x98   : > { %v579_v34 = vpop.permute.xlu0 %578 }
  0x9c   : > { %v669_v48 = vpop.permute.xlu1 %668 }
  0xa0   : > { %v756_v61 = vpop.permute.xlu1 %755 }
  0xf6   : > { %v1101_v23 = vpop.f32.mrf.mxu0 }
  0xf8   : > { %v1102_v25 = vpop.f32.mrf.mxu0 }
  0xf9   : > { %v1103_v26 = vadd.f32 %v1102_v25, %v1101_v23 }
  0xfa   : > { %v1104_v27 = vpop.f32.mrf.mxu0 }
  0xfb   : > { %v563_v28 = vadd.f32 %v1103_v26, %v426_v24 }
  0xfc   : > { %v1105_v29 = vpop.f32.mrf.mxu0 }
  0xfd   : > { %564 = vst.msk [vmem:[#allocation2] sm:$0xf] %vm386_vm0, %v563_v28 }
 0x104   : > { %v565_v31 = vld [vmem:[#allocation2] sm:$0xf] }
 0x105   : > { %v573_v32 = vmul.f32 %v1065_v30, %v565_v31 }
 0x107   : > { %1114 = vmatpush3.msk.msra.mxu1 %vm585_vm2, %v573_v32 }
 0x108   : > { %1116 = vmatmul.mubr.msk.f32.vlgmr.msra.gmra.mxu1 %vm581_vm3, %v574_v33  ;;  %1118 = vmatprep.subr.mxu1 %v1266_v20 }
 0x109   : > { %1120 = vmatprep.mubr.msk.f32.mxu1 %vm1267_vm1, %v1266_v20 }
 0x1c8   : > { %v655_v35 = vpop.f32.mrf.mxu1 }
 0x1c9   : > { %v656_v36 = vadd.f32 %v655_v35, %v579_v34 }
 0x1ca   : > { %v1117_v38 = vpop.f32.mrf.mxu1 }
 0x1cb   : > { %v659_v39 = vadd.f32 3.0, %v656_v36 }
 0x1cd   : > { %v660_v41 = vmax.f32 %v659_v39, 0.0 }
 0x1cf   : > { %v661_v42 = vmin.f32 %v660_v41, 6.0 }
 0x1d1   : > { %v662_v43 = vmul.f32 %v661_v42, %v656_v36 }
 0x1d3   : > { %v663_v44 = vmul.f32 0.16666667, %v662_v43 }
 0x1d5   : > { %759 = vrot.lane.b32.xlu0 %v663_v44, %s1269_s30  ;;  %1119 = vmatpush3.msra.mxu1 %v663_v44  ;;  %s1084_s30 = sshll.u32 %s1352_s21, 7  ;;  %s1270_s21 = smov [#allocation3]  }
 0x1d6   : > { %1121 = vmatmul.mubr.msk.f32.vlgmr.msra.gmra.mxu1 %vm671_vm4, %v664_v45  ;;  %1123 = vmatprep.subr.mxu1 %v1266_v20  ;;  %s1488_s16 = scalar_lea.hbm %s1534_s11, %s1084_s30  ;;  %s1208_s26 = sshll.u32 %s1270_s21, 4  ;;  %s1209_s26 = int_to_ptr.vmem [resolvable:$false] %s1208_s26 }
 0x1d7   : > { %1125 = vmatprep.mubr.msk.f32.mxu1 %vm1267_vm1, %v1266_v20  ;;  %s1210_s15 = scalar_lea.vmem %s1209_s26, 256  ;;  %p1211_p0 = scmp.lt.s32.totalorder %s984_s29, %s1209_s26 }
 0x1d8   : > { %p1212_p1 = scmp.lt.s32.totalorder %s1210_s15, %s1204_s23 }
 0x1da   : > { %p1213_p2 = por %p1212_p1, %p1211_p0 }
 0x1dc   : > { %p1214_p3 = pnand %p1213_p2, %p1207_p13 }
 0x247   : > { %v760_v47 = vpop.permute.xlu0 %759 }
 0x248   : > { %1124 = vmatpush3.msra.mxu1 %v760_v47 }
 0x249   : > { %1126 = vmatmul.mubr.msk.f32.vlgmr.msra.gmra.mxu1 %vm671_vm4, %v751_v46  ;;  %873 = vmatprep.subr.bf16.mxu1 %v1192_v53 }
 0x24a   : > { %891 = vmatprep.mubr.bf16.mxu1 %v1268_v22  ;;  %874 = vmatpush1.bf16.msra.mxu1 %v1190_v54 }
 0x24b   : > { %929 = vmatprep.subr.bf16.mxu1 %v1195_v56 }
 0x296   : > { %v741_v49 = vpop.f32.mrf.mxu1 }
 0x297   : > { %v742_v50 = vadd.f32 %v741_v49, %v669_v48 }
 0x298   : > { %v1122_v51 = vpop.f32.mrf.mxu1 }
 0x299   : > { %v1069_v52 = vmul.f32 -1.442695, %v742_v50 }
 0x29b   : > { %1196 = vpow2.f32 %v1069_v52 }
 0x2a8   : > { %v1197_v55 = vpop.eup %1196 }
 0x2a9   : > { %v748_v57 = vadd.f32 1.0, %v1197_v55 }
 0x2ab   : > { %1198 = vrcp.f32 %v748_v57 }
 0x2b8   : > { %v1199_v58 = vpop.eup %1198 }
 0x2b9   : > { %v841_v60 = vpack.c.bf16 %v1199_v58, %v1199_v58 }
 0x2bb   : > { %1074 = vmatmul.mubr.msk.bf16.vlgmr.msra.gmra.mxu1 %vm855_vm5, %v841_v60 }
 0x2bc   : > { %930 = vmatpush1.bf16.msra.mxu1 %v1193_v59  ;;  %947 = vmatprep.mubr.bf16.mxu1 %v1268_v22 }
 0x309   : > { %v831_v62 = vpop.f32.mrf.mxu1 }
 0x30a   : > { %v832_v63 = vadd.f32 %v831_v62, %v756_v61 }
 0x30b   : > { %v1127_v0 = vpop.f32.mrf.mxu1 }
 0x30c   : > { %v1071_v1 = vmul.f32 -1.442695, %v832_v63 }
 0x30e   : > { %1200 = vpow2.f32 %v1071_v1 }
 0x31b   : > { %v1201_v2 = vpop.eup %1200 }
 0x31c   : > { %v838_v3 = vadd.f32 1.0, %v1201_v2 }
 0x31e   : > { %1202 = vrcp.f32 %v838_v3 }
 0x32b   : > { %v1203_v4 = vpop.eup %1202 }
 0x32c   : > { %v842_v5 = vpack.c.bf16 %v1203_v4, %v1203_v4 }
 0x32e   : > { %1077 = vmatmul.mubr.msk.bf16.vlgmr.msra.gmra.mxu1 %vm855_vm5, %v842_v5 }
 0x37b   : > { %v893_v6 = vpop.f32.mrf.mxu1 }
 0x37d   : > { %v895_v7 = vpop.f32.mrf.mxu1 }
 0x37e   : > { %v959_v8 = vcombine.low %v893_v6, %v895_v7 }
 0x37f   : > { %v897_v9 = vpop.f32.mrf.mxu1 }
 0x380   : > { %v961_v14 = vmul.f32 %v959_v8, %v1417_v11 }
 0x381   : > { %v898_v10 = vpop.f32.mrf.mxu1 }
 0x3ee   : > { %v949_v12 = vpop.f32.mrf.mxu1 }
 0x3f0   : > { %v951_v13 = vpop.f32.mrf.mxu1 }
 0x3f1   : > { %v964_v15 = vcombine.low %v949_v12, %v951_v13 }
 0x3f2   : > { %v953_v16 = vpop.f32.mrf.mxu1 }
 0x3f3   : > { %v966_v17 = vmul.f32 %v964_v15, %v961_v14 }
 0x3f4   : > { %v954_v18 = vpop.f32.mrf.mxu1 }
 0x3f5   : > { %967 = vst [vmem:[%s379_s12] sm:$0xff] %v966_v17 }
 0x3f6   : > { %1217 = shalt.err (!%p1214_p3)
}
 0x3f7   : > { %s1218_s22 = scalar_lea.hbm %s1488_s16, 128  ;;  %s1222_s30 = scalar_lea.hbm %s1534_s11, 256 }
 0x3f8   : > { %p1219_p4 = scmp.ne.s32.totalorder %s1488_s16, %s1218_s22  ;;  %p1223_p9 = scmp.lt.s32.totalorder %s1488_s16, %s1534_s11 }
 0x3f9   : > { %p1224_p10 = scmp.lt.s32.totalorder %s1222_s30, %s1218_s22 }
 0x3fa   : > { %p1220_p7 = pnand %p1219_p4, %p1369_p5 }
 0x3fb   : > { %p1225_p11 = por %p1224_p10, %p1223_p9 }
 0x3fc   : > { %p1221_p8 = pneg %p1220_p7 }
 0x3fe   : > { %p1226_p12 = pnand %p1225_p11, %p1221_p8 }
 0x400   : > { %1229 = shalt.err (!%p1226_p12)
}
 0x401   : > { %1128 = dma.vmem_to_hbm [thread:$0]  (%p1369_p5), %s984_s29, 128, %s1488_s16, %s969_s19  }
 0x402 PF: > { %p1134_p13 = scmp.ge.s32.totalorder %s1264_s20, 2  ;;  %s995_s14 = sand.u32 1, %s1252_s17  }
 0x403   : > { %s996_s23 = scalar_lea.sflag [#allocation4], %s995_s14 }
 0x404   : > { %p1131_p0 = pnand %p1134_p13, %p1373_p6 }
 0x406   : > { %p1132_p1 = pneg %p1131_p0 }
 0x408   : > { %1247 = dma.done.wait (%p1132_p1), %s996_s23, 128  }
 0x409   : > { %1249 = vsyncadd (%p1132_p1), %s996_s23, 4294967168  ;;  %s1543_s20 = sld [smem:[#allocation7_spill]]  ;;  %s1546_s17 = smov %s1256_s18 }
 0x40a   : > { %s1544_s21 = sld [smem:[#allocation6_spill]] }
 0x40b   : > { %s1545_s19 = sld [smem:[#allocation8_spill]] }
 0x40f   : > { %p21_p2 = scmp.ge.s32.totalorder %s1543_s20, 4  }
 0x410   : > { %s1547_s18 = smov %s1544_s21 }
 0x411   :  { %23 = sbr.rel (!%p21_p2) target bundleno = 3 (0x3), region = 99 }
 0x416   :  { %1001 = vsyncpa [#allocation4], 1 }
 0x417   :  { %1003 = vsyncpa [#allocation4 + $0x1], 1 }

</bundles_post_ra>
